<compile_context>
chip_gen: v7x
topology: tpu7x:2x2x1
jax: 0.10.0
libtpu: 0.0.40
codegen_flags: <defaults>
</compile_context>

<pallas_src>
import functools

import jax
import jax.numpy as jnp
import numpy as np
from jax.experimental import pallas as pl
from jax.experimental.pallas import tpu as pltpu


# ----------------------------------------------------------------------------
# helpers
# ----------------------------------------------------------------------------
def _round_up(x, m):
    return ((x + m - 1) // m) * m


def _choose_tiling(hw, max_tile_hw, n_split):
    """Pick a 128-multiple lane tile <= max_tile_hw and pad HW so the grid
    splits evenly into n_split groups of nh tiles.  Padding waste is bounded by
    128 * n_tiles elements (no degenerate fallback to 128-wide tiles)."""
    max_tile = max(128, max_tile_hw - max_tile_hw % 128)
    n_tiles = -(-hw // max_tile)                      # ceil
    n_tiles = _round_up(n_tiles, n_split)
    tile = _round_up(-(-hw // n_tiles), 128)
    hw_pad = n_tiles * tile
    return tile, hw_pad, n_tiles // n_split


def _auto_vmem_limit(tile_hw, in_rows, out_rows, scratch_rows, elem_bytes=4):
    """Estimate per-step VMEM (8-sublane padding, double-buffered in/out) and
    return an explicit vmem_limit_bytes when it exceeds the conservative
    compiler default.  Capped at 44 MiB to leave headroom under v7x's 64 MiB
    physical VMEM (v5e/v6e have 128 MiB so the cap is always safe)."""
    pad8 = lambda r: _round_up(max(r, 1), 8)
    est = (sum(pad8(r) for r in in_rows) * 2
           + sum(pad8(r) for r in out_rows) * 2
           + scratch_rows * 8) * tile_hw * elem_bytes
    if est <= (16 << 20):
        return None                                   # compiler default is fine
    return int(min(max(est * 3 // 2, 32 << 20), 44 << 20))


def split_refine_params(w1, b1, w2, b2, topK):
    """Convert pixels-major (Cin,ngf)/(ngf,3) params to channels-major blocks.
    W1 is split per input group (im1 / im_sampled / weights) so no channel
    concat or NCHW->NHWC transpose is ever materialized."""
    w1t = w1.T                                # (ngf, Cin) with Cin = 3 + 3K + K
    w1t_im1 = w1t[:, :3]
    w1t_ims = w1t[:, 3:3 + 3 * topK]
    w1t_w = w1t[:, 3 + 3 * topK:]
    return (w1t_im1, w1t_ims, w1t_w,
            b1.reshape(-1, 1), w2.T, b2.reshape(-1, 1))


# ----------------------------------------------------------------------------
# Fused kernel: refine_rgb (1x1 conv -> ReLU -> 1x1 conv -> tanh)
#             + masked-L1 partial accumulation
#             + top-K weighted recombination (visualise branch)
# All blocks are channels-major (C, tile_hw): pixel axis lane-dense.
# ----------------------------------------------------------------------------
def _fused_kernel(x1_ref, xs_ref, xw_ref, gt_ref, samp_ref,
                  w1a_ref, w1b_ref, w1c_ref, b1_ref, w2_ref, b2_ref,
                  *refs, K, emit_comb):
    if emit_comb:
        pred_ref, comb_ref, num_ref, den_ref, num_sc, den_sc = refs
    else:
        pred_ref, num_ref, den_ref, num_sc, den_sc = refs
        comb_ref = None

    hid = pl.program_id(2)

    @pl.when(hid == 0)
    def _():
        num_sc[...] = jnp.zeros_like(num_sc)
        den_sc[...] = jnp.zeros_like(den_sc)

    x1 = x1_ref[...]                                            # (3,  tile)
    xs = xs_ref[...]                                            # (3K, tile)
    xw = xw_ref[...]                                            # (K,  tile)

    # ---- refine_rgb surrogate: y = W2t @ relu(W1at@x1 + W1bt@xs + W1ct@xw + b1) + b2
    h = jnp.dot(w1a_ref[...], x1, preferred_element_type=jnp.float32)
    h = h + jnp.dot(w1b_ref[...], xs, preferred_element_type=jnp.float32)
    h = h + jnp.dot(w1c_ref[...], xw, preferred_element_type=jnp.float32)
    h = jnp.maximum(h + b1_ref[...], 0.0)                       # (ngf, tile)
    pred = jnp.tanh(
        jnp.dot(w2_ref[...], h, preferred_element_type=jnp.float32) + b2_ref[...])
    pred_ref[...] = pred.astype(pred_ref.dtype)                 # (3, tile)

    # ---- masked-L1 accumulation (mask = max(|sampler|, ch) < 1), pure VPU per step
    s = samp_ref[...]                                           # (2, tile), f32
    mask = (jnp.maximum(jnp.abs(s[0:1, :]), jnp.abs(s[1:2, :])) < 1.0
            ).astype(jnp.float32)                               # (1, tile)
    diff = jnp.abs(pred - gt_ref[...].astype(jnp.float32))      # (3, tile)
    num_sc[...] += (diff[0:1, :] + diff[1:2, :] + diff[2:3, :]) * mask
    den_sc[...] += mask

    # ---- visualise branch: sum_k im_sampled[k] * w[k] / sum_k w[k]
    if emit_comb:
        w = xw.astype(jnp.float32)
        wsum = w[0:1, :]
        acc = xs[0:3, :].astype(jnp.float32) * w[0:1, :]
        for k in range(1, K):
            wsum = wsum + w[k:k + 1, :]
            acc = acc + xs[3 * k:3 * (k + 1), :].astype(jnp.float32) * w[k:k + 1, :]
        # Exact division (matches PyTorch, incl. wsum==0 -> inf/NaN); viz-only.
        comb_ref[...] = (acc / wsum).astype(comb_ref.dtype)

    # ---- cross-lane fold of the lane-parallel partials, once per (b, split)
    @pl.when(hid == pl.num_programs(2) - 1)
    def _():
        thw = num_sc.shape[-1]
        nacc = num_sc[:, 0:128]
        dacc = den_sc[:, 0:128]
        for r in range(1, thw // 128):                # static unrolled lane fold
            nacc = nacc + num_sc[:, r * 128:(r + 1) * 128]
            dacc = dacc + den_sc[:, r * 128:(r + 1) * 128]
        num_ref[...] = nacc
        den_ref[...] = dacc


def fused_refine_l1_combine(im1, im_sampled, gen_weights, gt, sampler12, params,
                            *, emit_comb, max_tile_hw=32768, n_split=2,
                            in_dtype=None, vmem_limit_bytes="auto"):
    """Returns (pred_image, im_comb_or_None, masked_L1_err)."""
    w1t_im1, w1t_ims, w1t_w, b1, w2t, b2 = params
    B, C1, H, W = im1.shape
    CK = im_sampled.shape[1]
    K = gen_weights.shape[1]
    ngf = w1t_im1.shape[0]
    HW = H * W

    x1 = im1.reshape(B, C1, HW)
    xs = im_sampled.reshape(B, CK, HW)
    xw = gen_weights.reshape(B, K, HW)
    g = gt.reshape(B, 3, HW)
    sp = sampler12.reshape(B, 2, HW)

    tile_hw, HW_pad, nh = _choose_tiling(HW, max_tile_hw, n_split)
    if HW_pad != HW:
        p = HW_pad - HW
        pad = ((0, 0), (0, 0), (0, p))
        x1 = jnp.pad(x1, pad)
        xs = jnp.pad(xs, pad)
        xw = jnp.pad(xw, pad, constant_values=1.0)    # wsum!=0 in pads
        g = jnp.pad(g, pad)
        sp = jnp.pad(sp, pad, constant_values=2.0)    # |s|>=1 -> mask=0 in pads

    if in_dtype is not None:
        # bf16 at the HBM boundary works on v5e/v6e/v7x alike (MXU takes bf16
        # with f32 accumulation); bias/ReLU/tanh math stays f32.  Loss inputs
        # (gt, sampler) stay f32.
        x1, xs, xw = (t.astype(in_dtype) for t in (x1, xs, xw))
        w1t_im1, w1t_ims, w1t_w, w2t = (
            t.astype(in_dtype) for t in (w1t_im1, w1t_ims, w1t_w, w2t))

    px = lambda b_, s_, h_: (b_, 0, s_ * nh + h_)
    const2 = lambda b_, s_, h_: (0, 0)
    part = lambda b_, s_, h_: (b_ * n_split + s_, 0, 0)

    in_specs = [
        pl.BlockSpec((None, C1, tile_hw), px),
        pl.BlockSpec((None, CK, tile_hw), px),
        pl.BlockSpec((None, K, tile_hw), px),
        pl.BlockSpec((None, 3, tile_hw), px),
        pl.BlockSpec((None, 2, tile_hw), px),
        pl.BlockSpec((ngf, C1), const2),
        pl.BlockSpec((ngf, CK), const2),
        pl.BlockSpec((ngf, K), const2),
        pl.BlockSpec((ngf, 1), const2),
        pl.BlockSpec((3, ngf), const2),
        pl.BlockSpec((3, 1), const2),
    ]

    out_specs = [pl.BlockSpec((None, 3, tile_hw), px)]
    out_shape = [jax.ShapeDtypeStruct((B, 3, HW_pad), jnp.float32)]
    if emit_comb:
        out_specs.append(pl.BlockSpec((None, 3, tile_hw), px))
        out_shape.append(jax.ShapeDtypeStruct((B, 3, HW_pad), jnp.float32))
    out_specs += [pl.BlockSpec((None, 1, 128), part),
                  pl.BlockSpec((None, 1, 128), part)]
    out_shape += [jax.ShapeDtypeStruct((B * n_split, 1, 128), jnp.float32),
                  jax.ShapeDtypeStruct((B * n_split, 1, 128), jnp.float32)]

    if vmem_limit_bytes == "auto":
        vmem_limit_bytes = _auto_vmem_limit(
            tile_hw,
            in_rows=(C1, CK, K, 3, 2),
            out_rows=(3, 3) if emit_comb else (3,),
            scratch_rows=2)
    cp_kwargs = dict(dimension_semantics=("parallel", "parallel", "arbitrary"))
    if vmem_limit_bytes is not None:
        cp_kwargs["vmem_limit_bytes"] = int(vmem_limit_bytes)

    outs = pl.pallas_call(
        functools.partial(_fused_kernel, K=K, emit_comb=emit_comb),
        out_shape=tuple(out_shape),
        grid_spec=pltpu.PrefetchScalarGridSpec(
            num_scalar_prefetch=0,
            grid=(B, n_split, nh),
            in_specs=in_specs,
            out_specs=tuple(out_specs),
            scratch_shapes=[pltpu.VMEM((1, tile_hw), jnp.float32),
                            pltpu.VMEM((1, tile_hw), jnp.float32)],
        ),
        compiler_params=pltpu.CompilerParams(**cp_kwargs),
    )(x1, xs, xw, g, sp, w1t_im1, w1t_ims, w1t_w, b1, w2t, b2)

    if emit_comb:
        pred_p, comb_p, num, den = outs
        im_comb = comb_p[:, :, :HW].reshape(B, 3, H, W)
    else:
        pred_p, num, den = outs
        im_comb = None
    pred = pred_p[:, :, :HW].reshape(B, 3, H, W)

    # TODO(synk): verify L1Mask normalization (per-element vs per-pixel, eps
    # value/placement) against the original losses.L1Mask before trusting scale.
    err = jnp.sum(num) / (3.0 * jnp.sum(den) + 1e-6)
    return pred, im_comb, err


# ----------------------------------------------------------------------------
# Glue: bilinear grid_sample (align_corners=True semantics of old F.grid_sample,
# zeros padding). Data-dependent gather -> plain JAX.
# TODO(synk): at realistic resolutions this XLA gather may dominate wall-clock;
# consider a Pallas DMA-gather kernel (and confirm align_corners vs the
# reference model's PyTorch version).
# ----------------------------------------------------------------------------
def grid_sample_bilinear(img, sampler):
    # img: (B, C, H, W); sampler: (B, 2, H, W) with channel 0 = x, 1 = y in [-1, 1]
    B, C, H, W = img.shape
    gx = sampler[:, 0]
    gy = sampler[:, 1]
    x = (gx + 1.0) * 0.5 * (W - 1)
    y = (gy + 1.0) * 0.5 * (H - 1)
    x0 = jnp.floor(x)
    y0 = jnp.floor(y)
    x1 = x0 + 1.0
    y1 = y0 + 1.0
    wx1 = x - x0
    wx0 = 1.0 - wx1
    wy1 = y - y0
    wy0 = 1.0 - wy1

    flat = img.reshape(B, C, H * W)

    def corner(ix, iy):
        valid = ((ix >= 0) & (ix <= W - 1) & (iy >= 0) & (iy <= H - 1)).astype(jnp.float32)
        ixc = jnp.clip(ix, 0, W - 1).astype(jnp.int32)
        iyc = jnp.clip(iy, 0, H - 1).astype(jnp.int32)
        idx = (iyc * W + ixc).reshape(B, 1, H * W)
        vals = jnp.take_along_axis(flat, idx, axis=2).reshape(B, C, H, W)
        return vals * valid[:, None, :, :]

    out = (corner(x0, y0) * (wx0 * wy0)[:, None]
           + corner(x1, y0) * (wx1 * wy0)[:, None]
           + corner(x0, y1) * (wx0 * wy1)[:, None]
           + corner(x1, y1) * (wx1 * wy1)[:, None])
    return out


# ----------------------------------------------------------------------------
# Forward pass (mirrors StylizeImageConcatenateInputs.forward with
# use_weights=True, use_image=True, network='unet', lambda1=1.0)
# ----------------------------------------------------------------------------
def stylize_forward(im1, im2, sampler12, im_sampled, gen_weights, params,
                    lambda1=1.0, visualise=True, refine_in_dtype=None):
    gt_pred_image = grid_sample_bilinear(im2, sampler12)

    K = gen_weights.shape[1]
    emit_comb = bool(visualise) and K > 1
    pred_image, im_comb, err = fused_refine_l1_combine(
        im1, im_sampled, gen_weights, gt_pred_image, sampler12, params,
        emit_comb=emit_comb, in_dtype=refine_in_dtype)

    losses = {'L1': err, 'Total Loss': err * lambda1}
    images = {}
    if visualise:
        im2sampled = im_comb if K > 1 else im_sampled
        images = {
            'Im1': im1 * 0.5 + 0.5,
            'PredIm': pred_image * 0.5 + 0.5,
            'Im2': im2 * 0.5 + 0.5,
            'GTIm': gt_pred_image * 0.5 + 0.5,
            'Im2Sampled': im2sampled * 0.5 + 0.5,
        }
    return losses, images


if __name__ == "__main__":
    key = jax.random.PRNGKey(0)
    B, H, W = 2, 16, 16
    topK = 2
    ngf = 32
    num_inputs = 4 * topK + 3  # use_weights + use_image -> 3 + 3*K + K = 11

    keys = jax.random.split(key, 10)
    im1 = jax.random.uniform(keys[0], (B, 3, H, W), jnp.float32, -1.0, 1.0)
    im2 = jax.random.uniform(keys[1], (B, 3, H, W), jnp.float32, -1.0, 1.0)
    sampler12 = jax.random.uniform(keys[2], (B, 2, H, W), jnp.float32, -1.2, 1.2)
    # synthetic outputs of obtain_matches (real op needs the pretrained feature model)
    im_sampled = jax.random.uniform(keys[3], (B, 3 * topK, H, W), jnp.float32, -1.0, 1.0)
    gen_weights = jax.random.uniform(keys[4], (B, topK, H, W), jnp.float32, 0.1, 1.0)

    # deterministic surrogate refine_rgb parameters (UNet replaced by 2-layer 1x1 conv)
    w1 = 0.1 * jax.random.normal(keys[5], (num_inputs, ngf), jnp.float32)
    b1 = 0.01 * jax.random.normal(keys[6], (1, ngf), jnp.float32)
    w2 = 0.1 * jax.random.normal(keys[7], (ngf, 3), jnp.float32)
    b2 = 0.01 * jax.random.normal(keys[8], (1, 3), jnp.float32)
    params = split_refine_params(w1, b1, w2, b2, topK)

    fwd = jax.jit(functools.partial(stylize_forward, lambda1=1.0, visualise=True))
    losses, images = fwd(im1, im2, sampler12, im_sampled, gen_weights, params)

    jax.block_until_ready(losses['Total Loss'])
    jax.block_until_ready(images['PredIm'])
    jax.block_until_ready(images['Im2Sampled'])

    # ---- lightweight pure-JAX reference check (correctness gate) ----
    xcat = jnp.concatenate([im1, im_sampled, gen_weights], 1).reshape(B, num_inputs, H * W)
    hid = jnp.maximum(
        jnp.einsum('io,bip->bop', w1, xcat, precision='highest')
        + b1.reshape(1, ngf, 1), 0.0)
    pred_ref = jnp.tanh(
        jnp.einsum('ho,bhp->bop', w2, hid, precision='highest')
        + b2.reshape(1, 3, 1)).reshape(B, 3, H, W)
    gt_ref = grid_sample_bilinear(im2, sampler12)
    mask_ref = (jnp.max(jnp.abs(sampler12), axis=1, keepdims=True) < 1.0).astype(jnp.float32)
    err_ref = jnp.sum(jnp.abs(pred_ref - gt_ref) * mask_ref) / (3.0 * jnp.sum(mask_ref) + 1e-6)
    wk = gen_weights[:, :, None]                                  # (B,K,1,H,W)
    comb_ref = (im_sampled.reshape(B, topK, 3, H, W) * wk).sum(1) / wk.sum(1)

    np.testing.assert_allclose(np.asarray(images['PredIm']),
                               np.asarray(pred_ref * 0.5 + 0.5), rtol=1e-2, atol=5e-3)
    np.testing.assert_allclose(float(losses['L1']), float(err_ref), rtol=1e-2, atol=5e-3)
    np.testing.assert_allclose(np.asarray(images['Im2Sampled']),
                               np.asarray(comb_ref * 0.5 + 0.5), rtol=1e-2, atol=5e-3)

    print("KERNEL_OK")
</pallas_src>

<mosaic_0001>
module attributes {stable_mosaic.version = 11 : i64} {
  func.func @_fused_kernel(%arg0: i32, %arg1: i32, %arg2: i32, %arg3: memref<1x3x128xf32, #tpu.memory_space<vmem>>, %arg4: memref<1x6x128xf32, #tpu.memory_space<vmem>>, %arg5: memref<1x2x128xf32, #tpu.memory_space<vmem>>, %arg6: memref<1x3x128xf32, #tpu.memory_space<vmem>>, %arg7: memref<1x2x128xf32, #tpu.memory_space<vmem>>, %arg8: memref<32x3xf32, #tpu.memory_space<vmem>>, %arg9: memref<32x6xf32, #tpu.memory_space<vmem>>, %arg10: memref<32x2xf32, #tpu.memory_space<vmem>>, %arg11: memref<32x1xf32, #tpu.memory_space<vmem>>, %arg12: memref<3x32xf32, #tpu.memory_space<vmem>>, %arg13: memref<3x1xf32, #tpu.memory_space<vmem>>, %arg14: memref<1x3x128xf32, #tpu.memory_space<vmem>>, %arg15: memref<1x3x128xf32, #tpu.memory_space<vmem>>, %arg16: memref<1x1x128xf32, #tpu.memory_space<vmem>>, %arg17: memref<1x1x128xf32, #tpu.memory_space<vmem>>, %arg18: memref<1x128xf32, #tpu.memory_space<vmem>>, %arg19: memref<1x128xf32, #tpu.memory_space<vmem>>) attributes {dimension_semantics = [#tpu.dimension_semantics<parallel>, #tpu.dimension_semantics<parallel>, #tpu.dimension_semantics<arbitrary>], iteration_bounds = array<i64: 2, 2, 1>, scalar_prefetch = 0 : i64, scratch_operands = 2 : i64, tpu.core_type = #tpu.core_type<tc>, window_params = [{transform_indices = @transform_0, window_bounds = array<i64: 1, 3, 128>}, {transform_indices = @transform_1, window_bounds = array<i64: 1, 6, 128>}, {transform_indices = @transform_2, window_bounds = array<i64: 1, 2, 128>}, {transform_indices = @transform_3, window_bounds = array<i64: 1, 3, 128>}, {transform_indices = @transform_4, window_bounds = array<i64: 1, 2, 128>}, {pipeline_mode = #tpu.pipeline_mode<synchronous>, transform_indices = @transform_5, window_bounds = array<i64: 32, 3>}, {pipeline_mode = #tpu.pipeline_mode<synchronous>, transform_indices = @transform_6, window_bounds = array<i64: 32, 6>}, {pipeline_mode = #tpu.pipeline_mode<synchronous>, transform_indices = @transform_7, window_bounds = array<i64: 32, 2>}, {pipeline_mode = #tpu.pipeline_mode<synchronous>, transform_indices = @transform_8, window_bounds = array<i64: 32, 1>}, {pipeline_mode = #tpu.pipeline_mode<synchronous>, transform_indices = @transform_9, window_bounds = array<i64: 3, 32>}, {pipeline_mode = #tpu.pipeline_mode<synchronous>, transform_indices = @transform_10, window_bounds = array<i64: 3, 1>}, {transform_indices = @transform_11, window_bounds = array<i64: 1, 3, 128>}, {transform_indices = @transform_12, window_bounds = array<i64: 1, 3, 128>}, {transform_indices = @transform_13, window_bounds = array<i64: 1, 1, 128>}, {transform_indices = @transform_14, window_bounds = array<i64: 1, 1, 128>}]} {
    %c0_i32 = arith.constant 0 : i32
    %0 = arith.cmpi eq, %arg2, %c0_i32 : i32
    %1 = arith.extui %0 : i1 to i32
    %c0_i32_0 = arith.constant 0 : i32
    %2 = arith.cmpi ne, %1, %c0_i32_0 : i32
    scf.if %2 {
      %cst_48 = arith.constant 0.000000e+00 : f32
      %78 = vector.broadcast %cst_48 : f32 to vector<1x128xf32>
      %c0_49 = arith.constant 0 : index
      %c0_50 = arith.constant 0 : index
      %79 = vector.load %arg18[%c0_49, %c0_50] : memref<1x128xf32, #tpu.memory_space<vmem>>, vector<1x128xf32>
      tpu.vector_store %arg18[%c0_49, %c0_50], %78 {strides = array<i32>} : memref<1x128xf32, #tpu.memory_space<vmem>>, vector<1x128xf32>,
      %cst_51 = arith.constant 0.000000e+00 : f32
      %80 = vector.broadcast %cst_51 : f32 to vector<1x128xf32>
      %c0_52 = arith.constant 0 : index
      %c0_53 = arith.constant 0 : index
      %81 = vector.load %arg19[%c0_52, %c0_53] : memref<1x128xf32, #tpu.memory_space<vmem>>, vector<1x128xf32>
      tpu.vector_store %arg19[%c0_52, %c0_53], %80 {strides = array<i32>} : memref<1x128xf32, #tpu.memory_space<vmem>>, vector<1x128xf32>,
    } else {
    }
    %c0 = arith.constant 0 : index
    %c0_1 = arith.constant 0 : index
    %c0_2 = arith.constant 0 : index
    %3 = vector.load %arg3[%c0, %c0_1, %c0_2] : memref<1x3x128xf32, #tpu.memory_space<vmem>>, vector<1x3x128xf32>
    %4 = vector.shape_cast %3 : vector<1x3x128xf32> to vector<3x128xf32>
    %c0_3 = arith.constant 0 : index
    %c0_4 = arith.constant 0 : index
    %c0_5 = arith.constant 0 : index
    %5 = vector.load %arg4[%c0_3, %c0_4, %c0_5] : memref<1x6x128xf32, #tpu.memory_space<vmem>>, vector<1x6x128xf32>
    %6 = vector.shape_cast %5 : vector<1x6x128xf32> to vector<6x128xf32>
    %c0_6 = arith.constant 0 : index
    %c0_7 = arith.constant 0 : index
    %c0_8 = arith.constant 0 : index
    %7 = vector.load %arg5[%c0_6, %c0_7, %c0_8] : memref<1x2x128xf32, #tpu.memory_space<vmem>>, vector<1x2x128xf32>
    %8 = vector.shape_cast %7 : vector<1x2x128xf32> to vector<2x128xf32>
    %c0_9 = arith.constant 0 : index
    %c0_10 = arith.constant 0 : index
    %9 = vector.load %arg8[%c0_9, %c0_10] : memref<32x3xf32, #tpu.memory_space<vmem>>, vector<32x3xf32>
    %cst = arith.constant dense<0.000000e+00> : vector<32x128xf32>
    %10 = tpu.matmul %9, %4, %cst {dimension_numbers = #tpu.dot_dimension_numbers<[1], [0], [0], [1], [0, 0, 1, 1], [], []>} : vector<32x3xf32>, vector<3x128xf32>, vector<32x128xf32> -> vector<32x128xf32>
    %c0_11 = arith.constant 0 : index
    %c0_12 = arith.constant 0 : index
    %11 = vector.load %arg9[%c0_11, %c0_12] : memref<32x6xf32, #tpu.memory_space<vmem>>, vector<32x6xf32>
    %cst_13 = arith.constant dense<0.000000e+00> : vector<32x128xf32>
    %12 = tpu.matmul %11, %6, %cst_13 {dimension_numbers = #tpu.dot_dimension_numbers<[1], [0], [0], [1], [0, 0, 1, 1], [], []>} : vector<32x6xf32>, vector<6x128xf32>, vector<32x128xf32> -> vector<32x128xf32>
    %13 = arith.addf %10, %12 : vector<32x128xf32>
    %c0_14 = arith.constant 0 : index
    %c0_15 = arith.constant 0 : index
    %14 = vector.load %arg10[%c0_14, %c0_15] : memref<32x2xf32, #tpu.memory_space<vmem>>, vector<32x2xf32>
    %cst_16 = arith.constant dense<0.000000e+00> : vector<32x128xf32>
    %15 = tpu.matmul %14, %8, %cst_16 {dimension_numbers = #tpu.dot_dimension_numbers<[1], [0], [0], [1], [0, 0, 1, 1], [], []>} : vector<32x2xf32>, vector<2x128xf32>, vector<32x128xf32> -> vector<32x128xf32>
    %16 = arith.addf %13, %15 : vector<32x128xf32>
    %c0_17 = arith.constant 0 : index
    %c0_18 = arith.constant 0 : index
    %17 = vector.load %arg11[%c0_17, %c0_18] : memref<32x1xf32, #tpu.memory_space<vmem>>, vector<32x1xf32>
    %18 = vector.broadcast %17 : vector<32x1xf32> to vector<32x128xf32>
    %19 = arith.addf %16, %18 : vector<32x128xf32>
    %cst_19 = arith.constant 0.000000e+00 : f32
    %20 = vector.broadcast %cst_19 : f32 to vector<32x128xf32>
    %21 = arith.maximumf %19, %20 : vector<32x128xf32>
    %c0_20 = arith.constant 0 : index
    %c0_21 = arith.constant 0 : index
    %22 = vector.load %arg12[%c0_20, %c0_21] : memref<3x32xf32, #tpu.memory_space<vmem>>, vector<3x32xf32>
    %cst_22 = arith.constant dense<0.000000e+00> : vector<3x128xf32>
    %23 = tpu.matmul %22, %21, %cst_22 {dimension_numbers = #tpu.dot_dimension_numbers<[1], [0], [0], [1], [0, 0, 1, 1], [], []>} : vector<3x32xf32>, vector<32x128xf32>, vector<3x128xf32> -> vector<3x128xf32>
    %c0_23 = arith.constant 0 : index
    %c0_24 = arith.constant 0 : index
    %24 = vector.load %arg13[%c0_23, %c0_24] : memref<3x1xf32, #tpu.memory_space<vmem>>, vector<3x1xf32>
    %25 = vector.broadcast %24 : vector<3x1xf32> to vector<3x128xf32>
    %26 = arith.addf %23, %25 : vector<3x128xf32>
    %27 = math.tanh %26 : vector<3x128xf32>
    %c0_25 = arith.constant 0 : index
    %c0_26 = arith.constant 0 : index
    %c0_27 = arith.constant 0 : index
    %28 = vector.load %arg14[%c0_25, %c0_26, %c0_27] : memref<1x3x128xf32, #tpu.memory_space<vmem>>, vector<1x3x128xf32>
    %29 = vector.shape_cast %28 : vector<1x3x128xf32> to vector<3x128xf32>
    %30 = vector.shape_cast %27 : vector<3x128xf32> to vector<1x3x128xf32>
    tpu.vector_store %arg14[%c0_25, %c0_26, %c0_27], %30 {strides = array<i32>} : memref<1x3x128xf32, #tpu.memory_space<vmem>>, vector<1x3x128xf32>,
    %c0_28 = arith.constant 0 : index
    %c0_29 = arith.constant 0 : index
    %c0_30 = arith.constant 0 : index
    %31 = vector.load %arg7[%c0_28, %c0_29, %c0_30] : memref<1x2x128xf32, #tpu.memory_space<vmem>>, vector<1x2x128xf32>
    %32 = vector.shape_cast %31 : vector<1x2x128xf32> to vector<2x128xf32>
    %33 = vector.extract_strided_slice %32 {offsets = [0, 0], sizes = [1, 128], strides = [1, 1]} : vector<2x128xf32> to vector<1x128xf32>
    %34 = math.absf %33 : vector<1x128xf32>
    %35 = vector.extract_strided_slice %32 {offsets = [1, 0], sizes = [1, 128], strides = [1, 1]} : vector<2x128xf32> to vector<1x128xf32>
    %36 = math.absf %35 : vector<1x128xf32>
    %37 = arith.maximumf %34, %36 : vector<1x128xf32>
    %cst_31 = arith.constant 1.000000e+00 : f32
    %38 = vector.broadcast %cst_31 : f32 to vector<1x128xf32>
    %39 = arith.cmpf olt, %37, %38 : vector<1x128xf32>
    %40 = arith.extui %39 : vector<1x128xi1> to vector<1x128xi32>
    %41 = arith.sitofp %40 : vector<1x128xi32> to vector<1x128xf32>
    %c0_32 = arith.constant 0 : index
    %c0_33 = arith.constant 0 : index
    %c0_34 = arith.constant 0 : index
    %42 = vector.load %arg6[%c0_32, %c0_33, %c0_34] : memref<1x3x128xf32, #tpu.memory_space<vmem>>, vector<1x3x128xf32>
    %43 = vector.shape_cast %42 : vector<1x3x128xf32> to vector<3x128xf32>
    %44 = arith.subf %27, %43 : vector<3x128xf32>
    %45 = math.absf %44 : vector<3x128xf32>
    %c0_35 = arith.constant 0 : index
    %c0_36 = arith.constant 0 : index
    %46 = vector.load %arg18[%c0_35, %c0_36] : memref<1x128xf32, #tpu.memory_space<vmem>>, vector<1x128xf32>
    %47 = vector.extract_strided_slice %45 {offsets = [0, 0], sizes = [1, 128], strides = [1, 1]} : vector<3x128xf32> to vector<1x128xf32>
    %48 = vector.extract_strided_slice %45 {offsets = [1, 0], sizes = [1, 128], strides = [1, 1]} : vector<3x128xf32> to vector<1x128xf32>
    %49 = arith.addf %47, %48 : vector<1x128xf32>
    %50 = vector.extract_strided_slice %45 {offsets = [2, 0], sizes = [1, 128], strides = [1, 1]} : vector<3x128xf32> to vector<1x128xf32>
    %51 = arith.addf %49, %50 : vector<1x128xf32>
    %52 = arith.mulf %51, %41 : vector<1x128xf32>
    %53 = arith.addf %46, %52 : vector<1x128xf32>
    %c0_37 = arith.constant 0 : index
    %c0_38 = arith.constant 0 : index
    %54 = vector.load %arg18[%c0_37, %c0_38] : memref<1x128xf32, #tpu.memory_space<vmem>>, vector<1x128xf32>
    tpu.vector_store %arg18[%c0_37, %c0_38], %53 {strides = array<i32>} : memref<1x128xf32, #tpu.memory_space<vmem>>, vector<1x128xf32>,
    %c0_39 = arith.constant 0 : index
    %c0_40 = arith.constant 0 : index
    %55 = vector.load %arg19[%c0_39, %c0_40] : memref<1x128xf32, #tpu.memory_space<vmem>>, vector<1x128xf32>
    %56 = arith.addf %55, %41 : vector<1x128xf32>
    %c0_41 = arith.constant 0 : index
    %c0_42 = arith.constant 0 : index
    %57 = vector.load %arg19[%c0_41, %c0_42] : memref<1x128xf32, #tpu.memory_space<vmem>>, vector<1x128xf32>
    tpu.vector_store %arg19[%c0_41, %c0_42], %56 {strides = array<i32>} : memref<1x128xf32, #tpu.memory_space<vmem>>, vector<1x128xf32>,
    %58 = vector.extract_strided_slice %8 {offsets = [0, 0], sizes = [1, 128], strides = [1, 1]} : vector<2x128xf32> to vector<1x128xf32>
    %59 = vector.extract_strided_slice %6 {offsets = [0, 0], sizes = [3, 128], strides = [1, 1]} : vector<6x128xf32> to vector<3x128xf32>
    %60 = vector.extract_strided_slice %8 {offsets = [0, 0], sizes = [1, 128], strides = [1, 1]} : vector<2x128xf32> to vector<1x128xf32>
    %61 = vector.broadcast %60 : vector<1x128xf32> to vector<3x128xf32>
    %62 = arith.mulf %59, %61 : vector<3x128xf32>
    %63 = vector.extract_strided_slice %8 {offsets = [1, 0], sizes = [1, 128], strides = [1, 1]} : vector<2x128xf32> to vector<1x128xf32>
    %64 = arith.addf %58, %63 : vector<1x128xf32>
    %65 = vector.extract_strided_slice %6 {offsets = [3, 0], sizes = [3, 128], strides = [1, 1]} : vector<6x128xf32> to vector<3x128xf32>
    %66 = vector.extract_strided_slice %8 {offsets = [1, 0], sizes = [1, 128], strides = [1, 1]} : vector<2x128xf32> to vector<1x128xf32>
    %67 = vector.broadcast %66 : vector<1x128xf32> to vector<3x128xf32>
    %68 = arith.mulf %65, %67 : vector<3x128xf32>
    %69 = arith.addf %62, %68 : vector<3x128xf32>
    %70 = vector.broadcast %64 : vector<1x128xf32> to vector<3x128xf32>
    %71 = arith.divf %69, %70 : vector<3x128xf32>
    %c0_43 = arith.constant 0 : index
    %c0_44 = arith.constant 0 : index
    %c0_45 = arith.constant 0 : index
    %72 = vector.load %arg15[%c0_43, %c0_44, %c0_45] : memref<1x3x128xf32, #tpu.memory_space<vmem>>, vector<1x3x128xf32>
    %73 = vector.shape_cast %72 : vector<1x3x128xf32> to vector<3x128xf32>
    %74 = vector.shape_cast %71 : vector<3x128xf32> to vector<1x3x128xf32>
    tpu.vector_store %arg15[%c0_43, %c0_44, %c0_45], %74 {strides = array<i32>} : memref<1x3x128xf32, #tpu.memory_space<vmem>>, vector<1x3x128xf32>,
    %c0_i32_46 = arith.constant 0 : i32
    %75 = arith.cmpi eq, %arg2, %c0_i32_46 : i32
    %76 = arith.extui %75 : i1 to i32
    %c0_i32_47 = arith.constant 0 : i32
    %77 = arith.cmpi ne, %76, %c0_i32_47 : i32
    scf.if %77 {
      %c0_48 = arith.constant 0 : index
      %c0_49 = arith.constant 0 : index
      %78 = vector.load %arg18[%c0_48, %c0_49] : memref<1x128xf32, #tpu.memory_space<vmem>>, vector<1x128xf32>
      %c0_50 = arith.constant 0 : index
      %c0_51 = arith.constant 0 : index
      %79 = vector.load %arg19[%c0_50, %c0_51] : memref<1x128xf32, #tpu.memory_space<vmem>>, vector<1x128xf32>
      %c0_52 = arith.constant 0 : index
      %c0_53 = arith.constant 0 : index
      %c0_54 = arith.constant 0 : index
      %80 = vector.load %arg16[%c0_52, %c0_53, %c0_54] : memref<1x1x128xf32, #tpu.memory_space<vmem>>, vector<1x1x128xf32>
      %81 = vector.shape_cast %80 : vector<1x1x128xf32> to vector<1x128xf32>
      %82 = vector.shape_cast %78 : vector<1x128xf32> to vector<1x1x128xf32>
      tpu.vector_store %arg16[%c0_52, %c0_53, %c0_54], %82 {strides = array<i32>} : memref<1x1x128xf32, #tpu.memory_space<vmem>>, vector<1x1x128xf32>,
      %c0_55 = arith.constant 0 : index
      %c0_56 = arith.constant 0 : index
      %c0_57 = arith.constant 0 : index
      %83 = vector.load %arg17[%c0_55, %c0_56, %c0_57] : memref<1x1x128xf32, #tpu.memory_space<vmem>>, vector<1x1x128xf32>
      %84 = vector.shape_cast %83 : vector<1x1x128xf32> to vector<1x128xf32>
      %85 = vector.shape_cast %79 : vector<1x128xf32> to vector<1x1x128xf32>
      tpu.vector_store %arg17[%c0_55, %c0_56, %c0_57], %85 {strides = array<i32>} : memref<1x1x128xf32, #tpu.memory_space<vmem>>, vector<1x1x128xf32>,
    } else {
    }
    return
  }
  func.func @transform_0(%arg0: i32, %arg1: i32, %arg2: i32) -> (i32, i32, i32) {
    %c1_i32 = arith.constant 1 : i32
    %0 = arith.muli %arg1, %c1_i32 : i32
    %1 = arith.addi %0, %arg2 : i32
    %c0_i32 = arith.constant 0 : i32
    %c0_i32_0 = arith.constant 0 : i32
    return %arg0, %c0_i32, %1 : i32, i32, i32
  }
  func.func @transform_1(%arg0: i32, %arg1: i32, %arg2: i32) -> (i32, i32, i32) {
    %c1_i32 = arith.constant 1 : i32
    %0 = arith.muli %arg1, %c1_i32 : i32
    %1 = arith.addi %0, %arg2 : i32
    %c0_i32 = arith.constant 0 : i32
    %c0_i32_0 = arith.constant 0 : i32
    return %arg0, %c0_i32, %1 : i32, i32, i32
  }
  func.func @transform_2(%arg0: i32, %arg1: i32, %arg2: i32) -> (i32, i32, i32) {
    %c1_i32 = arith.constant 1 : i32
    %0 = arith.muli %arg1, %c1_i32 : i32
    %1 = arith.addi %0, %arg2 : i32
    %c0_i32 = arith.constant 0 : i32
    %c0_i32_0 = arith.constant 0 : i32
    return %arg0, %c0_i32, %1 : i32, i32, i32
  }
  func.func @transform_3(%arg0: i32, %arg1: i32, %arg2: i32) -> (i32, i32, i32) {
    %c1_i32 = arith.constant 1 : i32
    %0 = arith.muli %arg1, %c1_i32 : i32
    %1 = arith.addi %0, %arg2 : i32
    %c0_i32 = arith.constant 0 : i32
    %c0_i32_0 = arith.constant 0 : i32
    return %arg0, %c0_i32, %1 : i32, i32, i32
  }
  func.func @transform_4(%arg0: i32, %arg1: i32, %arg2: i32) -> (i32, i32, i32) {
    %c1_i32 = arith.constant 1 : i32
    %0 = arith.muli %arg1, %c1_i32 : i32
    %1 = arith.addi %0, %arg2 : i32
    %c0_i32 = arith.constant 0 : i32
    %c0_i32_0 = arith.constant 0 : i32
    return %arg0, %c0_i32, %1 : i32, i32, i32
  }
  func.func @transform_5(%arg0: i32, %arg1: i32, %arg2: i32) -> (i32, i32) {
    %c0_i32 = arith.constant 0 : i32
    %c0_i32_0 = arith.constant 0 : i32
    %c0_i32_1 = arith.constant 0 : i32
    return %c0_i32, %c0_i32_0 : i32, i32
  }
  func.func @transform_6(%arg0: i32, %arg1: i32, %arg2: i32) -> (i32, i32) {
    %c0_i32 = arith.constant 0 : i32
    %c0_i32_0 = arith.constant 0 : i32
    %c0_i32_1 = arith.constant 0 : i32
    return %c0_i32, %c0_i32_0 : i32, i32
  }
  func.func @transform_7(%arg0: i32, %arg1: i32, %arg2: i32) -> (i32, i32) {
    %c0_i32 = arith.constant 0 : i32
    %c0_i32_0 = arith.constant 0 : i32
    %c0_i32_1 = arith.constant 0 : i32
    return %c0_i32, %c0_i32_0 : i32, i32
  }
  func.func @transform_8(%arg0: i32, %arg1: i32, %arg2: i32) -> (i32, i32) {
    %c0_i32 = arith.constant 0 : i32
    %c0_i32_0 = arith.constant 0 : i32
    %c0_i32_1 = arith.constant 0 : i32
    return %c0_i32, %c0_i32_0 : i32, i32
  }
  func.func @transform_9(%arg0: i32, %arg1: i32, %arg2: i32) -> (i32, i32) {
    %c0_i32 = arith.constant 0 : i32
    %c0_i32_0 = arith.constant 0 : i32
    %c0_i32_1 = arith.constant 0 : i32
    return %c0_i32, %c0_i32_0 : i32, i32
  }
  func.func @transform_10(%arg0: i32, %arg1: i32, %arg2: i32) -> (i32, i32) {
    %c0_i32 = arith.constant 0 : i32
    %c0_i32_0 = arith.constant 0 : i32
    %c0_i32_1 = arith.constant 0 : i32
    return %c0_i32, %c0_i32_0 : i32, i32
  }
  func.func @transform_11(%arg0: i32, %arg1: i32, %arg2: i32) -> (i32, i32, i32) {
    %c1_i32 = arith.constant 1 : i32
    %0 = arith.muli %arg1, %c1_i32 : i32
    %1 = arith.addi %0, %arg2 : i32
    %c0_i32 = arith.constant 0 : i32
    %c0_i32_0 = arith.constant 0 : i32
    return %arg0, %c0_i32, %1 : i32, i32, i32
  }
  func.func @transform_12(%arg0: i32, %arg1: i32, %arg2: i32) -> (i32, i32, i32) {
    %c1_i32 = arith.constant 1 : i32
    %0 = arith.muli %arg1, %c1_i32 : i32
    %1 = arith.addi %0, %arg2 : i32
    %c0_i32 = arith.constant 0 : i32
    %c0_i32_0 = arith.constant 0 : i32
    return %arg0, %c0_i32, %1 : i32, i32, i32
  }
  func.func @transform_13(%arg0: i32, %arg1: i32, %arg2: i32) -> (i32, i32, i32) {
    %c2_i32 = arith.constant 2 : i32
    %0 = arith.muli %arg0, %c2_i32 : i32
    %1 = arith.addi %0, %arg1 : i32
    %c0_i32 = arith.constant 0 : i32
    %c0_i32_0 = arith.constant 0 : i32
    %c0_i32_1 = arith.constant 0 : i32
    return %1, %c0_i32, %c0_i32_0 : i32, i32, i32
  }
  func.func @transform_14(%arg0: i32, %arg1: i32, %arg2: i32) -> (i32, i32, i32) {
    %c2_i32 = arith.constant 2 : i32
    %0 = arith.muli %arg0, %c2_i32 : i32
    %1 = arith.addi %0, %arg1 : i32
    %c0_i32 = arith.constant 0 : i32
    %c0_i32_0 = arith.constant 0 : i32
    %c0_i32_1 = arith.constant 0 : i32
    return %1, %c0_i32, %c0_i32_0 : i32, i32, i32
  }
}

</mosaic_0001>

<bundles_post_ra>
// kernel: stylize_forward.1
= control target key start
LH: loop header
LB: loop body
LE: loop exit
PB: predicated region body
PF: predicated region fallthrough
CT: control target
= control target key end

     0   :  { %s1794_s29 = smov 0   ;;  %s1796_s30 = smov 0   ;;  %s1965_s0 = inlined_call_operand.vmem [shape: f32[2,3,256], index: 0, kind: input, shape index: {}]   ;;  %s1966_s1 = inlined_call_operand.vmem [shape: f32[2,6,256], index: 1, kind: input, shape index: {}]   ;;  %s1967_s2 = inlined_call_operand.vmem [shape: f32[2,2,256], index: 2, kind: input, shape index: {}]   ;;  %s1968_s3 = inlined_call_operand.vmem [shape: f32[2,3,256], index: 3, kind: input, shape index: {}]   ;;  %s1969_s4 = inlined_call_operand.vmem [shape: f32[2,2,256], index: 4, kind: input, shape index: {}]   ;;  %s1970_s5 = inlined_call_operand.vmem [shape: f32[32,3], index: 5, kind: input, shape index: {}]   ;;  %s1971_s6 = inlined_call_operand.vmem [shape: f32[32,6], index: 6, kind: input, shape index: {}]   ;;  %s1972_s7 = inlined_call_operand.vmem [shape: f32[32,2], index: 7, kind: input, shape index: {}]   ;;  %s1973_s8 = inlined_call_operand.vmem [shape: f32[32,1], index: 8, kind: input, shape index: {}]   ;;  %s1974_s9 = inlined_call_operand.vmem [shape: f32[3,32], index: 9, kind: input, shape index: {}]   ;;  %s1975_s10 = inlined_call_operand.vmem [shape: f32[3,1], index: 10, kind: input, shape index: {}]   ;;  %s1976_s11 = inlined_call_operand.vmem [shape: f32[2,3,256], index: 11, kind: output, shape index: {0}]   ;;  %s1977_s12 = inlined_call_operand.vmem [shape: f32[2,3,256], index: 12, kind: output, shape index: {1}]   ;;  %s1978_s13 = inlined_call_operand.vmem [shape: f32[4,1,128], index: 13, kind: output, shape index: {2}]   ;;  %s1979_s14 = inlined_call_operand.vmem [shape: f32[4,1,128], index: 14, kind: output, shape index: {3}]  }
   0x1   :  { %s1798_s15 = smov 0   ;;  %s1800_s16 = smov 0  }
   0x2   :  { %s1802_s17 = smov 0  }
   0x3 LB: > { %1983 = sst [smem:[#allocation4_spill]] %s1705_s15  ;;  %s40_s18 = sadd.s32 1, %s1705_s15  ;;  %s1713_s17 = sphi %s1802_s17, %s25_s17   ;;  %s1709_s16 = sphi %s1800_s16, %s1992_s16   ;;  %s1705_s15 = sphi %s1798_s15, %s1991_s15   ;;  %s1701_s30 = sphi %s1796_s30, %s1990_s30   ;;  %s1697_s29 = sphi %s1794_s29, %s1989_s29  }
   0x4   : > { %1984 = sst [smem:[#allocation5_spill]] %s1709_s16  ;;  %s44_s19 = sadd.s32 1, %s1709_s16 }
   0x5   : > { %1985 = sst [smem:[#allocation6_spill]] %s1713_s17  ;;  %p42_p0 = scmp.ge.s32.totalorder %s40_s18, 2 }
   0x6   : > { %p1520_p1 = scmp.ge.s32.totalorder %s1713_s17, 1  ;;  %p539_p2 = scmp.lt.s32.totalorder %s1713_s17, 5 }
   0x7   : > { %s1994_s18 = smov (%p42_p0, %s40_s18), 0  ;;  %s1996_s19 = smov (!%p42_p0, %s44_s19), %s1709_s16 }
   0x8   : > { %1986 = sst [smem:[#allocation7_spill]] %s1994_s18  ;;  %p540_p3 = pnand %p1520_p1, %p539_p2 }
   0x9   : > { %p46_p4 = scmp.ge.s32.totalorder %s1996_s19, 2  ;;  %p649_p5 = scmp.lt.s32.totalorder (!%p540_p3), %s1701_s30, 1  ;;  %v741_v0 = vld [vmem:[%s1970_s5] sm:$0xff] (!%p540_p3)  ;;  %vm851_vm0 = vcmask (!%p540_p3), 23552   ;;  %vm749_vm1 = vcmask (!%p540_p3), 48128   ;;  %v1204_v2 = vlaneseq (!%p540_p3)  ;;  %v1715_v3 = vmov (!%p540_p3), 0  }
   0xa   : > { %543 = sbr.rel (%p540_p3) target bundleno = 510 (0x1fe), region = 64  ;;  %p651_p6 = scmp.lt.s32.totalorder (!%p540_p3), %s1697_s29, 1  ;;  %1586 = vmatprep.mubr.msk.f32.mxu0 (!%p540_p3), %vm851_vm0, %v741_v0  ;;  %v745_v1 = vld [vmem:[%s1971_s6] sm:$0xff] (!%p540_p3)  ;;  %1669 = vset.pattern.permute.xlu0 (!%p540_p3), %v1715_v3  ;;  %v1065_v5 = vld [vmem:[%s1973_s8 + $0x10] sm:$0xff] (!%p540_p3)  ;;  %vm864_vm2 = vcmask (!%p540_p3), 1042432   ;;  %v1064_v7 = vld [vmem:[%s1973_s8 + $0x8] sm:$0xff] (!%p540_p3) }
   0xb   : > { %s1998_s19 = smov (%p46_p4, %s1996_s19), 0  ;;  %1578 = vmatprep.mubr.msk.f32.mxu1 (!%p540_p3), %vm749_vm1, %v745_v1  ;;  %v1063_v4 = vld [vmem:[%s1973_s8] sm:$0xff] (!%p540_p3)  ;;  %1670 = vset.pattern.permute.xlu1 (!%p540_p3), %v1715_v3  ;;  %v1205_v6 = vshrl.u32 (!%p540_p3), %v1204_v2, 7  ;;  %v1066_v8 = vld [vmem:[%s1973_s8 + $0x18] sm:$0xff] (!%p540_p3)  ;;  %v742_v10 = vld [vmem:[%s1970_s5 + $0x8] sm:$0xff] (!%p540_p3)  ;;  %vm970_vm3 = vcmask (!%p540_p3), 1041408  }
   0xc   : > { %1987 = sst [smem:[#allocation8_spill]] %s1998_s19  ;;  %1069 = vperm.xlu0 (!%p540_p3), %1669, %v1063_v4   ;;  %1079 = vperm.xlu1 (!%p540_p3), %1670, %v1065_v5   ;;  %v743_v12 = vld [vmem:[%s1970_s5 + $0x10] sm:$0xff] (!%p540_p3)  ;;  %vm762_vm4 = vcmask (!%p540_p3), 1045504   ;;  %v1096_v14 = vld [vmem:[%s1975_s10] sm:$0x7] (!%p540_p3)  ;;  %v744_v17 = vld [vmem:[%s1970_s5 + $0x18] sm:$0xff] (!%p540_p3) }
   0xd   : > { %v1214_v11 = vsub.s32 (!%p540_p3), 1, %v1205_v6  ;;  %v1206_v15 = vsub.s32 (!%p540_p3), 0, %v1205_v6  ;;  %v746_v20 = vld [vmem:[%s1971_s6 + $0x8] sm:$0xff] (!%p540_p3)  ;;  %v953_v22 = vld [vmem:[%s1972_s7] sm:$0xff] (!%p540_p3)  ;;  %vm957_vm5 = vcmask (!%p540_p3), 15360   ;;  %v747_v23 = vld [vmem:[%s1971_s6 + $0x10] sm:$0xff] (!%p540_p3) }
   0xe   : > { %v954_v27 = vld [vmem:[%s1972_s7 + $0x8] sm:$0xff] (!%p540_p3)  ;;  %v748_v28 = vld [vmem:[%s1971_s6 + $0x18] sm:$0xff] (!%p540_p3)  ;;  %v955_v29 = vld [vmem:[%s1972_s7 + $0x10] sm:$0xff] (!%p540_p3)  ;;  %v1716_v37 = vmov (!%p540_p3), 0.0|0.0   ;;  %v1717_v40 = vmov (!%p540_p3), 0.0   ;;  %vm1718_vm6 = vmmov (!%p540_p3), 0  }
   0xf   : > { %v956_v32 = vld [vmem:[%s1972_s7 + $0x18] sm:$0xff] (!%p540_p3)  ;;  %736 = vst [vmem:[#allocation2] sm:$0x1] (!%p540_p3), %v1717_v40  ;;  %737 = vst [vmem:[#allocation3] sm:$0x1] (!%p540_p3), %v1717_v40  ;;  %vm1102_vm8 = vcmask (!%p540_p3), 261120  }
  0x10   : > { %1074 = vperm.xlu0 (!%p540_p3), %1669, %v1064_v7   ;;  %1084 = vperm.xlu1 (!%p540_p3), %1670, %v1066_v8   ;;  %v1095_v8 = vld [vmem:[%s1974_s9] sm:$0x7] (!%p540_p3) }
  0x11   : > { %s650_s24 = scalar_select %p649_p5, %s1701_s30, 1 }
  0x12   : > { %s652_s25 = scalar_select %p651_p6, %s1697_s29, 1 }
  0x13   : > { %s1521_s26 = sshll.u32 %s650_s24, 1 }
  0x14   : > { %s1843_s20 = sadd.s32 %s1521_s26, %s652_s25  ;;  %1099 = vperm.xlu0 %1669, %v1096_v14  }
  0x15   : > { %s1849_s23 = sshll.u32 %s1843_s20, 2  ;;  %s1526_s24 = sshll.u32 %s1843_s20, 1 }
  0x16   : > { %s656_s19 = scalar_lea.vmem %s1965_s0, %s1849_s23  ;;  %s676_s15 = scalar_lea.vmem %s1967_s2, %s1526_s24  ;;  %v1201_v43 = vld [vmem:[#allocation3] sm:$0x1] }
  0x17   : > { %v738_v9 = vld [vmem:[%s656_s19] sm:$0x7]  ;;  %s1524_s16 = sshll.u32 %s1843_s20, 3  ;;  %s716_s19 = scalar_lea.vmem %s1977_s12, %s1849_s23 }
  0x18   : > { %1584 = vmatprep.subr.msk.mxu0 %vm864_vm2, %v738_v9  ;;  %v740_v13 = vld [vmem:[%s676_s15] sm:$0x3]  ;;  %s666_s22 = scalar_lea.vmem %s1966_s1, %s1524_s16  ;;  %s1535_s15 = sshll.u32 %s1701_s30, 1 }
  0x19   : > { %1585 = vmatpush3.msk.msra.mxu0 %vm864_vm2, %v738_v9  ;;  %v1209_v16 = vrot.slane %v740_v13, 1  ;;  %v739_v18 = vld [vmem:[%s666_s22] sm:$0x3f]  ;;  %v1215_v19 = vrot.slane %v740_v13, %v1214_v11  ;;  %v1207_v25 = vrot.slane %v740_v13, %v1206_v15  ;;  %s696_s22 = scalar_lea.vmem %s1969_s4, %s1526_s24  ;;  %s719_s17 = sadd.s32 %s1697_s29, %s1535_s15 }
  0x1a   : > { %1587 = vmatmul.mubr.msk.f32.vlgmr.msra.gmra.mrb[0].mxu0 %vm851_vm0, %v742_v10  ;;  %1592 = vmatprep.subr.msk.mxu0 %vm970_vm3, %v740_v13  ;;  %v1178_v36 = vld [vmem:[%s696_s22] sm:$0x3]  ;;  %p720_p7 = scmp.lt.s32.totalorder %s719_s17, 3  ;;  %s686_s16 = scalar_lea.vmem %s1968_s3, %s1849_s23 }
  0x1b   : > { %1593 = vmatpush3.msk.msra.mxu0 %vm970_vm3, %v740_v13  ;;  %1589 = vmatprep.mubr.msk.f32.mxu0 %vm851_vm0, %v743_v12  ;;  %v1211_v21 = vadd.f32 %v1209_v16, %v740_v13  ;;  %v1216_v26 = vmul.f32 %v1215_v19, %v739_v18  ;;  %v1208_v30 = vmul.f32 %v1207_v25, %v739_v18  ;;  %v1179_v38 = vand.u32 2147483647, %v1178_v36  ;;  %s706_s26 = scalar_lea.vmem %s1976_s11, %s1849_s23  ;;  %v1187_v13 = vld [vmem:[%s686_s16] sm:$0x7] }
  0x1c   : > { %1576 = vmatprep.subr.msk.mxu1 %vm762_vm4, %v739_v18  ;;  %s2000_s17 = smov (!%p720_p7, %s719_s17), 3 }
  0x1d   : > { %1577 = vmatpush3.msk.msra.mxu1 %vm762_vm4, %v739_v18  ;;  %v1224_v24 = vrot.slane %v1211_v21, %v1206_v15  ;;  %v1218_v31 = vrot.slane %v1216_v26, 3  ;;  %v1181_v39 = vrot.slane %v1179_v38, 1  ;;  %s729_s27 = scalar_lea.vmem %s1979_s14, %s2000_s17  ;;  %v1190_v21 = vld [vmem:[#allocation2] sm:$0x1]  ;;  %s722_s15 = scalar_lea.vmem %s1978_s13, %s2000_s17 }
  0x1e   : > { %1590 = vmatmul.mubr.msk.f32.gmra.mrb[2].mxu0 %vm851_vm0, %v744_v17  ;;  %1579 = vmatmul.mubr.msk.f32.vlgmr.msra.gmra.mrb[0].mxu1 %vm749_vm1, %v746_v20 }
  0x1f   : > { %1594 = vmatprep.mubr.msk.f32.mxu0 %vm957_vm5, %v953_v22  ;;  %1581 = vmatprep.mubr.msk.f32.mxu1 %vm749_vm1, %v747_v23  ;;  %1671 = vrcp.f32 %v1224_v24  ;;  %v1220_v33 = vadd.f32 %v1218_v31, %v1208_v30  ;;  %v1183_v41 = vmax.f32 %v1179_v38, %v1181_v39 }
  0x20   : > { %1611 = vmatprep.subr.bf16.mxu1 %v1716_v37 }
  0x21   : > { %vm1184_vm7 = vcmp.lt.f32.partialorder %v1183_v41, 1.0 }
  0x22   : > { %1595 = vmatmul.mubr.msk.f32.vlgmr.msra.gmra.mrb[0].mxu0 %vm957_vm5, %v954_v27  ;;  %1582 = vmatmul.mubr.msk.f32.gmra.mrb[2].mxu1 %vm749_vm1, %v748_v28  ;;  %v1553_v42 = vsel %vm1184_vm7, 1.0, %v1717_v40 }
  0x23   : > { %1597 = vmatprep.mubr.msk.f32.mxu0 %vm957_vm5, %v955_v29  ;;  %1608 = vmatprep.mubr.msk.f32.mxu1 %vm1718_vm6, %v1717_v40  ;;  %v1202_v44 = vadd.f32 %v1553_v42, %v1201_v43 }
  0x25   : > { %1203 = vst [vmem:[#allocation3] sm:$0x1] %v1202_v44 }
  0x26   : > { %1598 = vmatmul.mubr.msk.f32.gmra.mrb[2].mxu0 %vm957_vm5, %v956_v32 }
  0x29   : > { %v1672_v34 = vpop.eup %1671 }
  0x2a   : > { %v1226_v35 = vmul.f32 %v1672_v34, %v1220_v33 }
  0x2c   : > { %1227 = vst [vmem:[%s716_s19] sm:$0x7] %v1226_v35  ;;  %v1232_v45 = vld [vmem:[#allocation3] sm:$0x1] }
  0x2d   : > { %1234 = vst [vmem:[%s729_s27] sm:$0x1] %v1232_v45 }
  0x8b   : > { %v1070_v46 = vpop.permute.xlu0 %1069  ;;  %v1080_v49 = vpop.permute.xlu1 %1079 }
  0x8f   : > { %v1075_v55 = vpop.permute.xlu0 %1074  ;;  %v1085_v0 = vpop.permute.xlu1 %1084 }
  0x93   : > { %v1100_v9 = vpop.permute.xlu0 %1099 }
  0xf1   : > { %v1580_v47 = vpop.f32.mrb[0].mxu1 }
  0xf2   : > { %v832_v48 = vpop.f32.mrb[1].mxu1 }
  0xf5   : > { %v1596_v50 = vpop.f32.mrb[0].mxu0  ;;  %v1583_v51 = vpop.f32.mrb[2].mxu1 }
  0xf6   : > { %v1617_v52 = vadd.f32 %v1596_v50, %v1580_v47  ;;  %v1040_v53 = vpop.f32.mrb[1].mxu0  ;;  %v842_v54 = vpop.f32.mrb[3].mxu1 }
  0xf7   : > { %v1618_v56 = vadd.f32 %v1040_v53, %v832_v48 }
  0xf8   : > { %v1088_v57 = vadd.f32 %v1617_v52, %v1075_v55 }
  0xf9   : > { %v1087_v58 = vadd.f32 %v1618_v56, %v1070_v46  ;;  %v1599_v59 = vpop.f32.mrb[2].mxu0 }
  0xfa   : > { %v1092_v60 = vmax.f32 %v1088_v57, 0.0  ;;  %v1619_v61 = vadd.f32 %v1599_v59, %v1583_v51  ;;  %v1050_v62 = vpop.f32.mrb[3].mxu0 }
  0xfb   : > { %v1091_v63 = vmax.f32 %v1087_v58, 0.0  ;;  %v1620_v1 = vadd.f32 %v1050_v62, %v842_v54 }
  0xfc   : > { %v1090_v2 = vadd.f32 %v1619_v61, %v1085_v0 }
  0xfd   : > { %v1612_v3 = vpack.c.bf16 %v1092_v60, %v1091_v63  ;;  %v1089_v4 = vadd.f32 %v1620_v1, %v1080_v49 }
  0xfe   : > { %v1094_v5 = vmax.f32 %v1090_v2, 0.0 }
  0xff   : > { %v1093_v6 = vmax.f32 %v1089_v4, 0.0  ;;  %1613 = vmatpush3.bf16.msra.mxu1 %v1612_v3 }
 0x100   : > { %1614 = vmatprep.subr.bf16.mxu1 %v1716_v37 }
 0x101   : > { %v1615_v7 = vpack.c.bf16 %v1094_v5, %v1093_v6 }
 0x103   : > { %1616 = vmatpush3.bf16.msra.mxu1 %v1615_v7 }
 0x106   : > { %1609 = vmatmul.mubr.msk.f32.vlgmr.msra.gmra.mrb[4].mxu1 %vm1102_vm8, %v1095_v8 }
 0x1d9   : > { %v1172_v10 = vpop.f32.mrb[4].mxu1 }
 0x1da   : > { %v1173_v11 = vadd.f32 %v1172_v10, %v1100_v9  ;;  %v1610_v12 = vpop.f32.mrb[5].mxu1 }
 0x1dc   : > { %1673 = vtanh.f32 %v1173_v11 }
 0x1e6   : > { %v1674_v14 = vpop.eup %1673 }
 0x1e7   : > { %1177 = vst [vmem:[%s706_s26] sm:$0x7] %v1674_v14  ;;  %v1188_v15 = vsub.f32 %v1674_v14, %v1187_v13 }
 0x1e9   : > { %v1189_v16 = vand.u32 2147483647, %v1188_v15 }
 0x1eb   : > { %v1192_v17 = vrot.slane %v1189_v16, 1  ;;  %v1195_v19 = vrot.slane %v1189_v16, 2 }
 0x1ed   : > { %v1194_v18 = vadd.f32 %v1192_v17, %v1189_v16 }
 0x1ef   : > { %v1197_v20 = vadd.f32 %v1195_v19, %v1194_v18 }
 0x1f1   : > { %v1198_v22 = vmul.f32 %v1553_v42, %v1197_v20 }
 0x1f3   : > { %v1199_v23 = vadd.f32 %v1198_v22, %v1190_v21 }
 0x1f5   : > { %1200 = vst [vmem:[#allocation2] sm:$0x1] %v1199_v23 }
 0x1fc   : > { %v1231_v24 = vld [vmem:[#allocation2] sm:$0x1] }
 0x1fd   : > { %1233 = vst [vmem:[%s722_s15] sm:$0x1] %v1231_v24 }
 0x1fe PF: > { %s1988_s23 = sld [smem:[#allocation6_spill]]  ;;  %s1989_s29 = sld [smem:[#allocation4_spill]] }
 0x1ff   : > { %s1990_s30 = sld [smem:[#allocation5_spill]]  ;;  %s1991_s15 = sld [smem:[#allocation7_spill]] }
 0x200   : > { %s1992_s16 = sld [smem:[#allocation8_spill]] }
 0x204   : > { %s25_s17 = sadd.s32 1, %s1988_s23  }
 0x205   : > { %p22_p8 = scmp.ge.s32.totalorder %s25_s17, 6  }
 0x207   :  { %24 = sbr.rel (!%p22_p8) target bundleno = 3 (0x3), region = 150 }

</bundles_post_ra>
